<compile_context>
chip_gen: v7x
topology: tpu7x:2x2x1
jax: 0.10.0
libtpu: 0.0.40
codegen_flags: <defaults>
</compile_context>

<pallas_src>
import jax
import jax.numpy as jnp
from jax.experimental import pallas as pl
from jax.experimental.pallas import tpu as pltpu


def _compl_mul_kernel(x_ref, w_ref, o_ref):
    """Mode-wise complex channel mixing, lane-dense over the mode axis.

    x_ref : [TB, 2*Cin, TM]   packed Re/Im of the truncated spectrum (f32)
    w_ref : [Cin, 2*Cout, TM] packed Re/Im of the weights (f32)
    o_ref : [TB, 2*Cout, TM]  packed Re/Im of x (*) w
    """
    cin = x_ref.shape[1] // 2
    cout = o_ref.shape[1] // 2

    x = x_ref[...]
    w = w_ref[...]

    xr = x[:, :cin, :]          # [TB, Cin, TM]
    xi = x[:, cin:, :]
    wr = w[:, :cout, :]         # [Cin, Cout, TM]
    wi = w[:, cout:, :]

    tb = x.shape[0]
    tm = x.shape[-1]

    acc_re = jnp.zeros((tb, cout, tm), jnp.float32)
    acc_im = jnp.zeros((tb, cout, tm), jnp.float32)

    # Unrolled VPU multiply-accumulate over the (small) Cin axis.
    # (xr + i*xi)(wr + i*wi) = (xr*wr - xi*wi) + i(xr*wi + xi*wr)
    for i in range(cin):
        xr_i = xr[:, i:i + 1, :]            # [TB, 1, TM]
        xi_i = xi[:, i:i + 1, :]
        wr_i = wr[i]                        # [Cout, TM]
        wi_i = wi[i]
        acc_re = acc_re + xr_i * wr_i - xi_i * wi_i
        acc_im = acc_im + xr_i * wi_i + xi_i * wr_i

    # Single full-block, lane-dense store.
    o_ref[...] = jnp.concatenate([acc_re, acc_im], axis=1)


def _choose_mode_tile(M, cin, cout, tb=1):
    """Pick the lane tile (multiple of 128) and padded mode length."""
    LANE = 128
    # f32 bytes per lane column across all blocks of one grid step.
    rows = tb * 2 * cin + cin * 2 * cout + tb * 2 * cout
    per_lane_bytes = 4 * rows
    # Conservative double-buffered working-set budget (fits v7x's 64 MiB VMEM
    # with lots of headroom; v5e/v6e have 128 MiB).
    budget = 24 * 1024 * 1024
    cap = (budget // (2 * per_lane_bytes)) // LANE * LANE
    cap = max(LANE, min(2048, cap))
    m_rounded = ((M + LANE - 1) // LANE) * LANE
    tm = min(m_rounded, cap)
    mpad = ((M + tm - 1) // tm) * tm
    return tm, mpad


def _pallas_compl_mul(x_packed, w_packed, tm):
    """x_packed: [B,2*Cin,Mpad]; w_packed: [Cin,2*Cout,Mpad] -> [B,2*Cout,Mpad]."""
    B, two_cin, Mpad = x_packed.shape
    cin = two_cin // 2
    cout = w_packed.shape[1] // 2
    tb = 1                                   # batch tile (inner grid axis)

    n_mode = Mpad // tm
    n_batch = B // tb
    grid = (n_mode, n_batch)                 # mode OUTER, batch INNER

    x_spec = pl.BlockSpec((tb, two_cin, tm), lambda m, b: (b, 0, m))
    w_spec = pl.BlockSpec((cin, 2 * cout, tm), lambda m, b: (0, 0, m))
    o_spec = pl.BlockSpec((tb, 2 * cout, tm), lambda m, b: (b, 0, m))

    # VMEM limit derived from actual double-buffered per-step buffer bytes.
    rows = tb * two_cin + cin * 2 * cout + tb * 2 * cout
    per_step_bytes = 4 * rows * tm
    vmem_limit = int(min(64 * 1024 * 1024,
                         max(8 * per_step_bytes, 8 * 1024 * 1024)))

    cost = pl.CostEstimate(
        flops=8 * B * cin * cout * Mpad,
        transcendentals=0,
        bytes_accessed=4 * Mpad * (B * two_cin + cin * 2 * cout + B * 2 * cout),
    )

    return pl.pallas_call(
        _compl_mul_kernel,
        out_shape=jax.ShapeDtypeStruct((B, 2 * cout, Mpad), jnp.float32),
        grid=grid,
        in_specs=[x_spec, w_spec],
        out_specs=o_spec,
        compiler_params=pltpu.CompilerParams(
            dimension_semantics=("parallel", "parallel"),
            vmem_limit_bytes=vmem_limit,
        ),
        cost_estimate=cost,
    )(x_packed, w_packed)


def spectral_conv2d_fast(x, weights1, weights2, modes1, modes2):
    """Forward pass of SpectralConv2d_fast.

    x        : [B, Cin, H, W] float32  (NCHW, same as PyTorch)
    weights1 : [Cin, Cout, modes1, modes2] complex64  (low-frequency rows)
    weights2 : [Cin, Cout, modes1, modes2] complex64  (high-frequency rows)
    returns  : [B, Cout, H, W] float32
    """
    B, Cin, H, W = x.shape
    Cout = weights1.shape[1]
    m1, m2 = modes1, modes2
    Wr = W // 2 + 1

    # ---- FFT (plain JAX / XLA) ----
    x_ft = jnp.fft.rfft2(x)                                   # [B, Cin, H, Wr] c64

    # ---- lane-dense mode packing with Re/Im stacked on the channel axis ----
    mm = m1 * m2
    M = 2 * mm
    tm, Mpad = _choose_mode_tile(M, Cin, Cout, tb=1)
    pad = Mpad - M

    x_top = x_ft[:, :, :m1, :m2].reshape(B, Cin, mm)
    x_bot = x_ft[:, :, H - m1:, :m2].reshape(B, Cin, mm)
    x_modes = jnp.concatenate([x_top, x_bot], axis=-1)        # [B, Cin, M]
    x_packed = jnp.concatenate(
        [jnp.real(x_modes), jnp.imag(x_modes)], axis=1
    ).astype(jnp.float32)                                     # [B, 2*Cin, M]
    if pad:
        x_packed = jnp.pad(x_packed, ((0, 0), (0, 0), (0, pad)))

    w_modes = jnp.concatenate(
        [weights1.reshape(Cin, Cout, mm), weights2.reshape(Cin, Cout, mm)],
        axis=-1)                                              # [Cin, Cout, M]
    w_packed = jnp.concatenate(
        [jnp.real(w_modes), jnp.imag(w_modes)], axis=1
    ).astype(jnp.float32)                                     # [Cin, 2*Cout, M]
    if pad:
        w_packed = jnp.pad(w_packed, ((0, 0), (0, 0), (0, pad)))

    # ---- Pallas hot path ----
    out = _pallas_compl_mul(x_packed, w_packed, tm)           # [B, 2*Cout, Mpad]

    out_c = jax.lax.complex(out[:, :Cout, :M], out[:, Cout:, :M])   # [B, Cout, M]
    out_top = out_c[:, :, :mm].reshape(B, Cout, m1, m2)
    out_bot = out_c[:, :, mm:].reshape(B, Cout, m1, m2)

    # ---- spectrum assembly: pad/concat, no zeroed-buffer scatter ----
    if 2 * m1 <= H:
        col_pad = ((0, 0), (0, 0), (0, 0), (0, Wr - m2))
        top_rows = jnp.pad(out_top, col_pad)                  # [B, Cout, m1, Wr]
        bot_rows = jnp.pad(out_bot, col_pad)                  # [B, Cout, m1, Wr]
        mid_rows = jnp.zeros((B, Cout, H - 2 * m1, Wr), dtype=out_c.dtype)
        out_ft = jnp.concatenate([top_rows, mid_rows, bot_rows], axis=2)
    else:
        # Overlapping slabs: keep the reference's overwrite semantics.
        out_ft = jnp.zeros((B, Cout, H, Wr), dtype=jnp.complex64)
        out_ft = out_ft.at[:, :, :m1, :m2].set(out_top)
        out_ft = out_ft.at[:, :, H - m1:, :m2].set(out_bot)

    # ---- inverse FFT ----
    return jnp.fft.irfft2(out_ft, s=(H, W)).astype(jnp.float32)


def _reference(x, weights1, weights2, modes1, modes2):
    """Pure-JAX reference mirroring the PyTorch forward exactly."""
    B, Cin, H, W = x.shape
    Cout = weights1.shape[1]
    x_ft = jnp.fft.rfft2(x)
    out_ft = jnp.zeros((B, Cout, H, W // 2 + 1), dtype=jnp.complex64)
    out_ft = out_ft.at[:, :, :modes1, :modes2].set(
        jnp.einsum('bixy,ioxy->boxy', x_ft[:, :, :modes1, :modes2], weights1))
    out_ft = out_ft.at[:, :, H - modes1:, :modes2].set(
        jnp.einsum('bixy,ioxy->boxy', x_ft[:, :, H - modes1:, :modes2], weights2))
    return jnp.fft.irfft2(out_ft, s=(H, W))


if __name__ == "__main__":
    batch, in_channels, out_channels = 2, 4, 4
    H = W = 16
    modes1, modes2 = 6, 6
    scale = 1.0 / (in_channels * out_channels)

    key = jax.random.PRNGKey(0)
    kx, k1r, k1i, k2r, k2i = jax.random.split(key, 5)

    x = jax.random.normal(kx, (batch, in_channels, H, W), dtype=jnp.float32)

    # Matches torch.rand(..., dtype=cfloat): real and imag parts uniform in [0, 1).
    w_shape = (in_channels, out_channels, modes1, modes2)
    weights1 = scale * (jax.random.uniform(k1r, w_shape, jnp.float32)
                        + 1j * jax.random.uniform(k1i, w_shape, jnp.float32))
    weights2 = scale * (jax.random.uniform(k2r, w_shape, jnp.float32)
                        + 1j * jax.random.uniform(k2i, w_shape, jnp.float32))
    weights1 = weights1.astype(jnp.complex64)
    weights2 = weights2.astype(jnp.complex64)

    out = spectral_conv2d_fast(x, weights1, weights2, modes1, modes2)
    out = jax.block_until_ready(out)

    ref = _reference(x, weights1, weights2, modes1, modes2)
    assert out.shape == (batch, out_channels, H, W)
    assert jnp.allclose(out, ref, atol=1e-4, rtol=1e-4), "mismatch vs reference"

    print("KERNEL_OK")
</pallas_src>

<mosaic_0001>
module attributes {stable_mosaic.version = 11 : i64} {
  func.func @_compl_mul_kernel(%arg0: i32, %arg1: i32, %arg2: memref<1x8x128xf32, #tpu.memory_space<vmem>>, %arg3: memref<4x8x128xf32, #tpu.memory_space<vmem>>, %arg4: memref<1x8x128xf32, #tpu.memory_space<vmem>>) attributes {dimension_semantics = [#tpu.dimension_semantics<parallel>, #tpu.dimension_semantics<parallel>], iteration_bounds = array<i64: 1, 2>, scalar_prefetch = 0 : i64, scratch_operands = 0 : i64, tpu.core_type = #tpu.core_type<tc>, window_params = [{transform_indices = @transform_0, window_bounds = array<i64: 1, 8, 128>}, {transform_indices = @transform_1, window_bounds = array<i64: 4, 8, 128>}, {transform_indices = @transform_2, window_bounds = array<i64: 1, 8, 128>}]} {
    %c0 = arith.constant 0 : index
    %c0_0 = arith.constant 0 : index
    %c0_1 = arith.constant 0 : index
    %0 = vector.load %arg2[%c0, %c0_0, %c0_1] : memref<1x8x128xf32, #tpu.memory_space<vmem>>, vector<1x8x128xf32>
    %c0_2 = arith.constant 0 : index
    %c0_3 = arith.constant 0 : index
    %c0_4 = arith.constant 0 : index
    %1 = vector.load %arg3[%c0_2, %c0_3, %c0_4] : memref<4x8x128xf32, #tpu.memory_space<vmem>>, vector<4x8x128xf32>
    %2 = vector.extract_strided_slice %0 {offsets = [0, 0, 0], sizes = [1, 4, 128], strides = [1, 1, 1]} : vector<1x8x128xf32> to vector<1x4x128xf32>
    %3 = vector.extract_strided_slice %0 {offsets = [0, 4, 0], sizes = [1, 4, 128], strides = [1, 1, 1]} : vector<1x8x128xf32> to vector<1x4x128xf32>
    %4 = vector.extract_strided_slice %1 {offsets = [0, 0, 0], sizes = [4, 4, 128], strides = [1, 1, 1]} : vector<4x8x128xf32> to vector<4x4x128xf32>
    %5 = vector.extract_strided_slice %1 {offsets = [0, 4, 0], sizes = [4, 4, 128], strides = [1, 1, 1]} : vector<4x8x128xf32> to vector<4x4x128xf32>
    %cst = arith.constant 0.000000e+00 : f32
    %6 = vector.broadcast %cst : f32 to vector<1x4x128xf32>
    %cst_5 = arith.constant 0.000000e+00 : f32
    %7 = vector.broadcast %cst_5 : f32 to vector<1x4x128xf32>
    %8 = vector.extract_strided_slice %2 {offsets = [0, 0, 0], sizes = [1, 1, 128], strides = [1, 1, 1]} : vector<1x4x128xf32> to vector<1x1x128xf32>
    %9 = vector.extract_strided_slice %3 {offsets = [0, 0, 0], sizes = [1, 1, 128], strides = [1, 1, 1]} : vector<1x4x128xf32> to vector<1x1x128xf32>
    %10 = vector.extract_strided_slice %4 {offsets = [0, 0, 0], sizes = [1, 4, 128], strides = [1, 1, 1]} : vector<4x4x128xf32> to vector<1x4x128xf32>
    %11 = vector.shape_cast %10 : vector<1x4x128xf32> to vector<4x128xf32>
    %12 = vector.extract_strided_slice %5 {offsets = [0, 0, 0], sizes = [1, 4, 128], strides = [1, 1, 1]} : vector<4x4x128xf32> to vector<1x4x128xf32>
    %13 = vector.shape_cast %12 : vector<1x4x128xf32> to vector<4x128xf32>
    %14 = vector.shape_cast %11 : vector<4x128xf32> to vector<1x4x128xf32>
    %15 = vector.broadcast %8 : vector<1x1x128xf32> to vector<1x4x128xf32>
    %16 = arith.mulf %15, %14 : vector<1x4x128xf32>
    %17 = arith.addf %6, %16 : vector<1x4x128xf32>
    %18 = vector.shape_cast %13 : vector<4x128xf32> to vector<1x4x128xf32>
    %19 = vector.broadcast %9 : vector<1x1x128xf32> to vector<1x4x128xf32>
    %20 = arith.mulf %19, %18 : vector<1x4x128xf32>
    %21 = arith.subf %17, %20 : vector<1x4x128xf32>
    %22 = vector.shape_cast %13 : vector<4x128xf32> to vector<1x4x128xf32>
    %23 = vector.broadcast %8 : vector<1x1x128xf32> to vector<1x4x128xf32>
    %24 = arith.mulf %23, %22 : vector<1x4x128xf32>
    %25 = arith.addf %7, %24 : vector<1x4x128xf32>
    %26 = vector.shape_cast %11 : vector<4x128xf32> to vector<1x4x128xf32>
    %27 = vector.broadcast %9 : vector<1x1x128xf32> to vector<1x4x128xf32>
    %28 = arith.mulf %27, %26 : vector<1x4x128xf32>
    %29 = arith.addf %25, %28 : vector<1x4x128xf32>
    %30 = vector.extract_strided_slice %2 {offsets = [0, 1, 0], sizes = [1, 1, 128], strides = [1, 1, 1]} : vector<1x4x128xf32> to vector<1x1x128xf32>
    %31 = vector.extract_strided_slice %3 {offsets = [0, 1, 0], sizes = [1, 1, 128], strides = [1, 1, 1]} : vector<1x4x128xf32> to vector<1x1x128xf32>
    %32 = vector.extract_strided_slice %4 {offsets = [1, 0, 0], sizes = [1, 4, 128], strides = [1, 1, 1]} : vector<4x4x128xf32> to vector<1x4x128xf32>
    %33 = vector.shape_cast %32 : vector<1x4x128xf32> to vector<4x128xf32>
    %34 = vector.extract_strided_slice %5 {offsets = [1, 0, 0], sizes = [1, 4, 128], strides = [1, 1, 1]} : vector<4x4x128xf32> to vector<1x4x128xf32>
    %35 = vector.shape_cast %34 : vector<1x4x128xf32> to vector<4x128xf32>
    %36 = vector.shape_cast %33 : vector<4x128xf32> to vector<1x4x128xf32>
    %37 = vector.broadcast %30 : vector<1x1x128xf32> to vector<1x4x128xf32>
    %38 = arith.mulf %37, %36 : vector<1x4x128xf32>
    %39 = arith.addf %21, %38 : vector<1x4x128xf32>
    %40 = vector.shape_cast %35 : vector<4x128xf32> to vector<1x4x128xf32>
    %41 = vector.broadcast %31 : vector<1x1x128xf32> to vector<1x4x128xf32>
    %42 = arith.mulf %41, %40 : vector<1x4x128xf32>
    %43 = arith.subf %39, %42 : vector<1x4x128xf32>
    %44 = vector.shape_cast %35 : vector<4x128xf32> to vector<1x4x128xf32>
    %45 = vector.broadcast %30 : vector<1x1x128xf32> to vector<1x4x128xf32>
    %46 = arith.mulf %45, %44 : vector<1x4x128xf32>
    %47 = arith.addf %29, %46 : vector<1x4x128xf32>
    %48 = vector.shape_cast %33 : vector<4x128xf32> to vector<1x4x128xf32>
    %49 = vector.broadcast %31 : vector<1x1x128xf32> to vector<1x4x128xf32>
    %50 = arith.mulf %49, %48 : vector<1x4x128xf32>
    %51 = arith.addf %47, %50 : vector<1x4x128xf32>
    %52 = vector.extract_strided_slice %2 {offsets = [0, 2, 0], sizes = [1, 1, 128], strides = [1, 1, 1]} : vector<1x4x128xf32> to vector<1x1x128xf32>
    %53 = vector.extract_strided_slice %3 {offsets = [0, 2, 0], sizes = [1, 1, 128], strides = [1, 1, 1]} : vector<1x4x128xf32> to vector<1x1x128xf32>
    %54 = vector.extract_strided_slice %4 {offsets = [2, 0, 0], sizes = [1, 4, 128], strides = [1, 1, 1]} : vector<4x4x128xf32> to vector<1x4x128xf32>
    %55 = vector.shape_cast %54 : vector<1x4x128xf32> to vector<4x128xf32>
    %56 = vector.extract_strided_slice %5 {offsets = [2, 0, 0], sizes = [1, 4, 128], strides = [1, 1, 1]} : vector<4x4x128xf32> to vector<1x4x128xf32>
    %57 = vector.shape_cast %56 : vector<1x4x128xf32> to vector<4x128xf32>
    %58 = vector.shape_cast %55 : vector<4x128xf32> to vector<1x4x128xf32>
    %59 = vector.broadcast %52 : vector<1x1x128xf32> to vector<1x4x128xf32>
    %60 = arith.mulf %59, %58 : vector<1x4x128xf32>
    %61 = arith.addf %43, %60 : vector<1x4x128xf32>
    %62 = vector.shape_cast %57 : vector<4x128xf32> to vector<1x4x128xf32>
    %63 = vector.broadcast %53 : vector<1x1x128xf32> to vector<1x4x128xf32>
    %64 = arith.mulf %63, %62 : vector<1x4x128xf32>
    %65 = arith.subf %61, %64 : vector<1x4x128xf32>
    %66 = vector.shape_cast %57 : vector<4x128xf32> to vector<1x4x128xf32>
    %67 = vector.broadcast %52 : vector<1x1x128xf32> to vector<1x4x128xf32>
    %68 = arith.mulf %67, %66 : vector<1x4x128xf32>
    %69 = arith.addf %51, %68 : vector<1x4x128xf32>
    %70 = vector.shape_cast %55 : vector<4x128xf32> to vector<1x4x128xf32>
    %71 = vector.broadcast %53 : vector<1x1x128xf32> to vector<1x4x128xf32>
    %72 = arith.mulf %71, %70 : vector<1x4x128xf32>
    %73 = arith.addf %69, %72 : vector<1x4x128xf32>
    %74 = vector.extract_strided_slice %2 {offsets = [0, 3, 0], sizes = [1, 1, 128], strides = [1, 1, 1]} : vector<1x4x128xf32> to vector<1x1x128xf32>
    %75 = vector.extract_strided_slice %3 {offsets = [0, 3, 0], sizes = [1, 1, 128], strides = [1, 1, 1]} : vector<1x4x128xf32> to vector<1x1x128xf32>
    %76 = vector.extract_strided_slice %4 {offsets = [3, 0, 0], sizes = [1, 4, 128], strides = [1, 1, 1]} : vector<4x4x128xf32> to vector<1x4x128xf32>
    %77 = vector.shape_cast %76 : vector<1x4x128xf32> to vector<4x128xf32>
    %78 = vector.extract_strided_slice %5 {offsets = [3, 0, 0], sizes = [1, 4, 128], strides = [1, 1, 1]} : vector<4x4x128xf32> to vector<1x4x128xf32>
    %79 = vector.shape_cast %78 : vector<1x4x128xf32> to vector<4x128xf32>
    %80 = vector.shape_cast %77 : vector<4x128xf32> to vector<1x4x128xf32>
    %81 = vector.broadcast %74 : vector<1x1x128xf32> to vector<1x4x128xf32>
    %82 = arith.mulf %81, %80 : vector<1x4x128xf32>
    %83 = arith.addf %65, %82 : vector<1x4x128xf32>
    %84 = vector.shape_cast %79 : vector<4x128xf32> to vector<1x4x128xf32>
    %85 = vector.broadcast %75 : vector<1x1x128xf32> to vector<1x4x128xf32>
    %86 = arith.mulf %85, %84 : vector<1x4x128xf32>
    %87 = arith.subf %83, %86 : vector<1x4x128xf32>
    %88 = vector.shape_cast %79 : vector<4x128xf32> to vector<1x4x128xf32>
    %89 = vector.broadcast %74 : vector<1x1x128xf32> to vector<1x4x128xf32>
    %90 = arith.mulf %89, %88 : vector<1x4x128xf32>
    %91 = arith.addf %73, %90 : vector<1x4x128xf32>
    %92 = vector.shape_cast %77 : vector<4x128xf32> to vector<1x4x128xf32>
    %93 = vector.broadcast %75 : vector<1x1x128xf32> to vector<1x4x128xf32>
    %94 = arith.mulf %93, %92 : vector<1x4x128xf32>
    %95 = arith.addf %91, %94 : vector<1x4x128xf32>
    %96 = tpu.concatenate %87, %95 in 1 : vector<1x4x128xf32>, vector<1x4x128xf32> -> vector<1x8x128xf32>
    %c0_6 = arith.constant 0 : index
    %c0_7 = arith.constant 0 : index
    %c0_8 = arith.constant 0 : index
    %97 = vector.load %arg4[%c0_6, %c0_7, %c0_8] : memref<1x8x128xf32, #tpu.memory_space<vmem>>, vector<1x8x128xf32>
    tpu.vector_store %arg4[%c0_6, %c0_7, %c0_8], %96 {strides = array<i32>} : memref<1x8x128xf32, #tpu.memory_space<vmem>>, vector<1x8x128xf32>,
    return
  }
  func.func @transform_0(%arg0: i32, %arg1: i32) -> (i32, i32, i32) {
    %c0_i32 = arith.constant 0 : i32
    %c0_i32_0 = arith.constant 0 : i32
    return %arg1, %c0_i32, %arg0 : i32, i32, i32
  }
  func.func @transform_1(%arg0: i32, %arg1: i32) -> (i32, i32, i32) {
    %c0_i32 = arith.constant 0 : i32
    %c0_i32_0 = arith.constant 0 : i32
    %c0_i32_1 = arith.constant 0 : i32
    return %c0_i32, %c0_i32_0, %arg0 : i32, i32, i32
  }
  func.func @transform_2(%arg0: i32, %arg1: i32) -> (i32, i32, i32) {
    %c0_i32 = arith.constant 0 : i32
    %c0_i32_0 = arith.constant 0 : i32
    return %arg1, %c0_i32, %arg0 : i32, i32, i32
  }
}

</mosaic_0001>

<bundles_post_ra>
// kernel: tpu_custom_call.1
= control target key start
LH: loop header
LB: loop body
LE: loop exit
PB: predicated region body
PF: predicated region fallthrough
CT: control target
= control target key end

     0   :  { %7 = vsyncpa [#allocation3], 0  ;;  %s854_s0 = inlined_call_operand.hbm [shape: f32[2,8,128], index: 0, kind: input, shape index: {}]   ;;  %s855_s1 = inlined_call_operand.hbm [shape: f32[4,8,128], index: 1, kind: input, shape index: {}]   ;;  %s856_s2 = inlined_call_operand.hbm [shape: f32[2,8,128], index: 2, kind: output, shape index: {}]  }
   0x1   :  { %9 = vsyncpa [#allocation3 + $0x1], 0 }
   0x2   :  { %10 = vsyncpa [#allocation6], 0 }
   0x3   :  { %11 = vsyncpa [#allocation4], 0 }
   0x4   :  { %13 = vsyncpa [#allocation4 + $0x1], 0  ;;  %s636_s9 = smov 0   ;;  %s638_s10 = smov 0  }
   0x5   :  { %s640_s11 = smov 0   ;;  %s642_s12 = smov 0  }
   0x6   :  { %s644_s13 = smov 0   ;;  %s646_s14 = smov 0  }
   0x7 LB: > { %s380_s15 = sadd.s32 4294967295, %s614_s14   ;;  %s381_s16 = sadd.s32 4294967294, %s614_s14   ;;  %s614_s14 = sphi %s646_s14, %s19_s14   ;;  %s610_s13 = sphi %s644_s13, %s880_s13   ;;  %s606_s12 = sphi %s642_s12, %s879_s12   ;;  %s602_s11 = sphi %s640_s11, %s878_s11   ;;  %s598_s10 = sphi %s638_s10, %s877_s10   ;;  %s594_s9 = sphi %s636_s9, %s876_s9  }
   0x8   : > { %p53_p0 = scmp.ne.s32.totalorder %s598_s10, %s594_s9  ;;  %p670_p1 = scmp.eq.s32.totalorder %s380_s15, 0 }
   0x9   : > { %p674_p2 = scmp.eq.s32.totalorder %s380_s15, 1  ;;  %p111_p3 = scmp.eq.s32.totalorder %s381_s16, 1 }
   0xa   : > { %s861_s17 = scalar_select %p670_p1, 1, 0 }
   0xb   : > { %s862_s18 = scalar_select %p674_p2, 1, 0 }
   0xc   : > { %p680_p4 = por %p670_p1, %p53_p0  ;;  %p382_p5 = scmp.ge.s32.totalorder %s614_s14, 1 }
   0xd   : > { %p685_p6 = por %p111_p3, %p53_p0  ;;  %p118_p7 = scmp.lt.s32.totalorder %s614_s14, 3 }
   0xe   : > { %s863_s19 = scalar_select %p680_p4, 1, 0 }
   0xf   : > { %s864_s20 = scalar_select %p685_p6, 1, 0 }
  0x10   : > { %p690_p8 = pnand %p382_p5, %p118_p7  ;;  %s616_s22 = smov [#allocation5]  }
  0x11   : > { %s132_s23 = sshll.u32 %s616_s22, 4  ;;  %s28_s25 = sadd.s32 1, %s610_s13  ;;  %s133_s23 = int_to_ptr.vmem [resolvable:$true] %s132_s23 }
  0x12   : > { %s865_s21 = scalar_select %p690_p8, 1, 0 }
  0x13   : > { %p403_p9 = pneg %p690_p8  ;;  %s470_s28 = scalar_lea.hbm %s855_s1, 512 }
  0x14   : > { %p471_p12 = scmp.ne.s32.totalorder %s855_s1, %s470_s28  ;;  %p477_p5 = scmp.lt.u32.totalorder %s470_s28, %s855_s1 }
  0x15   : > { %p699_p11 = pnand %p403_p9, %p670_p1 }
  0x17   : > { %p472_p13 = pneg %p699_p11 }
  0x19   : > { %p473_p0 = pnand %p472_p13, %p471_p12 }
  0x1b   : > { %p474_p3 = pneg %p473_p0 }
  0x1d   : > { %p479_p7 = pnand %p477_p5, %p474_p3 }
  0x1f   : > { %482 = shalt.err (!%p479_p7)
}
  0x20   : > { %s483_s5 = scalar_lea.vmem %s133_s23, 512  ;;  %p491_p1 = scmp.lt.s32.totalorder %s133_s23, %s133_s23 }
  0x21   : > { %p484_p9 = scmp.ne.s32.totalorder %s133_s23, %s483_s5  ;;  %p492_p4 = scmp.lt.s32.totalorder %s483_s5, %s483_s5 }
  0x23   : > { %p486_p10 = pnand %p484_p9, %p472_p13  ;;  %p493_p8 = por %p492_p4, %p491_p1 }
  0x25   : > { %p487_p6 = pneg %p486_p10 }
  0x27   : > { %p494_p2 = pnand %p493_p8, %p487_p6 }
  0x29   : > { %497 = shalt.err (!%p494_p2)
}
  0x2a   : > { %s617_s6 = smov 128   ;;  %s618_s7 = smov 8  }
  0x2b   : > { %406 = dma.hbm_to_vmem [thread:$0]  (!%p699_p11), %s855_s1, 512, %s133_s23, [#allocation6], %s617_s6, %s617_s6, %s618_s7  }
  0x2c   : > { %p29_p1 = scmp.ge.s32.totalorder %s28_s25, 2  ;;  %s40_s16 = sadd.s32 1, %s602_s11 }
  0x2d   : > { %p47_p2 = scmp.ne.s32.totalorder %s602_s11, %s598_s10  ;;  %p48_p4 = scmp.eq.s32.totalorder %s614_s14, 0 }
  0x2e   : > { %s882_s25 = smov (%p29_p1, %s28_s25), 0  ;;  %p868_p8 = scmp.ne.s32.totalorder %s862_s18, 0 }
  0x2f   : > { %p726_p6 = por %p48_p4, %p47_p2  ;;  %s35_s24 = ssub.s32 %s610_s13, %s882_s25 }
  0x30   : > { %p732_p10 = por %p868_p8, %p47_p2  ;;  %p416_p12 = scmp.lt.s32.totalorder %s614_s14, 2 }
  0x31   : > { %p38_p11 = scmp.eq.s32.totalorder %s35_s24, 0  ;;  %s146_s23 = sand.u32 1, %s602_s11  }
  0x32   : > { %s385_s27 = sshll.u32 %s146_s23, 3  ;;  %s386_s29 = sshll.u32 %s610_s13, 7 }
  0x33   : > { %s741_s28 = scalar_select %p38_p11, %s602_s11, %s40_s16  }
  0x34   : > { %s747_s4 = scalar_lea.hbm %s854_s0, %s386_s29  ;;  %s150_s18 = scalar_lea.vmem [#allocation2], %s385_s27 }
  0x35   : > { %s158_s5 = sshll.u32 %s150_s18, 4  ;;  %p753_p13 = pnand %p416_p12, %p726_p6  ;;  %s749_s5 = int_to_ptr.vmem [resolvable:$true] %s158_s5 }
  0x36   : > { %s147_s7 = scalar_lea.sflag [#allocation3], %s146_s23  ;;  %s498_s8 = scalar_lea.hbm %s747_s4, 128 }
  0x37   : > { %p499_p0 = scmp.ne.s32.totalorder %s747_s4, %s498_s8  ;;  %p500_p3 = pneg %p753_p13 }
  0x38   : > { %s503_s24 = scalar_lea.hbm %s854_s0, 256  ;;  %p504_p9 = scmp.lt.u32.totalorder %s747_s4, %s854_s0 }
  0x39   : > { %p501_p5 = pnand %p500_p3, %p499_p0  ;;  %p505_p1 = scmp.lt.u32.totalorder %s503_s24, %s498_s8 }
  0x3a   : > { %p507_p4 = scmp.lt.u32.totalorder %s498_s8, %s747_s4 }
  0x3b   : > { %p502_p7 = pneg %p501_p5  ;;  %p506_p2 = por %p505_p1, %p504_p9 }
  0x3d   : > { %p508_p6 = por %p507_p4, %p506_p2 }
  0x3f   : > { %p509_p8 = pnand %p508_p6, %p502_p7 }
  0x41   : > { %512 = shalt.err (!%p509_p8)
}
  0x42   : > { %s513_s23 = scalar_lea.vmem %s749_s5, 128  ;;  %s619_s29 = smov [#allocation2]  }
  0x43   : > { %p514_p12 = scmp.ne.s32.totalorder %s749_s5, %s513_s23  ;;  %s518_s30 = sshll.u32 %s619_s29, 4  ;;  %s519_s30 = int_to_ptr.vmem [resolvable:$false] %s518_s30 }
  0x44   : > { %s520_s3 = scalar_lea.vmem %s519_s30, 256  ;;  %p521_p5 = scmp.lt.s32.totalorder %s749_s5, %s519_s30 }
  0x45   : > { %p516_p11 = pnand %p514_p12, %p500_p3  ;;  %p522_p9 = scmp.lt.s32.totalorder %s520_s3, %s513_s23 }
  0x47   : > { %p517_p0 = pneg %p516_p11  ;;  %p523_p1 = por %p522_p9, %p521_p5 }
  0x49   : > { %p524_p2 = pnand %p523_p1, %p517_p0 }
  0x4b   : > { %527 = shalt.err (!%p524_p2)
}
  0x4c   : > { %410 = dma.hbm_to_vmem [thread:$0]  (!%p753_p13), %s747_s4, 128, %s749_s5, %s147_s7  }
  0x4d   : > { %p871_p7 = scmp.ne.s32.totalorder %s865_s21, 0 }
  0x4e   : > { %s785_s18 = sand.u32 (!%p871_p7), 1, %s598_s10   ;;  %p872_p3 = scmp.ne.s32.totalorder (!%p871_p7), %s863_s19, 0 }
  0x4f   : > { %167 = sbr.rel (%p871_p7) target bundleno = 131 (0x83), region = 28  ;;  %s388_s8 = sshll.u32 (!%p871_p7), %s785_s18, 3 }
  0x50   : > { %s170_s15 = scalar_lea.sflag (!%p871_p7), [#allocation3], %s785_s18  ;;  %s173_s16 = scalar_lea.vmem (!%p871_p7), [#allocation2], %s388_s8 }
  0x56   : > { %581 = dma.done.wait (%p872_p3), %s170_s15, 128  }
  0x57   : > { %583 = vsyncadd (%p872_p3), %s170_s15, 4294967168  ;;  %p873_p13 = scmp.ne.s32.totalorder %s861_s17, 0 }
  0x59   : > { %585 = dma.done.wait (%p873_p13), [#allocation6], 512  }
  0x5a   : > { %587 = vsyncadd (%p873_p13), [#allocation6], 4294966784  ;;  %v203_v0 = vlaneseq  ;;  %v198_v7 = vld [vmem:[%s173_s16] sm:$0xff]  ;;  %v199_v8 = vld [vmem:[#allocation5] sm:$0xff]  ;;  %s197_s17 = scalar_lea.vmem [#allocation7], %s388_s8  ;;  %s392_s21 = sshll.u32 %s606_s12, 7 }
  0x5b   : > { %v200_v9 = vld [vmem:[#allocation5 + $0x8] sm:$0xff]  ;;  %v201_v20 = vld [vmem:[#allocation5 + $0x10] sm:$0xff]  ;;  %v202_v30 = vld [vmem:[#allocation5 + $0x18] sm:$0xff]  ;;  %s288_s19 = sshll.u32 %s197_s17, 4  ;;  %vm270_vm0 = vcmask 1043456   ;;  %s807_s6 = scalar_lea.hbm %s856_s2, %s392_s21  ;;  %s802_s19 = int_to_ptr.vmem [resolvable:$true] %s288_s19 }
  0x5c   : > { %v204_v1 = vshrl.u32 %v203_v0, 7  ;;  %s274_s7 = scalar_lea.sflag [#allocation4], %s785_s18  ;;  %s528_s24 = scalar_lea.vmem %s802_s19, 128 }
  0x5d   : > { %p529_p4 = scmp.ne.s32.totalorder %s802_s19, %s528_s24  ;;  %s620_s12 = smov [#allocation7]  }
  0x5e   : > { %v205_v2 = vsub.s32 0, %v204_v1  ;;  %v211_v3 = vsub.s32 4, %v204_v1  ;;  %v221_v4 = vsub.s32 1, %v204_v1  ;;  %v227_v5 = vsub.s32 5, %v204_v1  ;;  %s532_s22 = sshll.u32 %s620_s12, 4  ;;  %s533_s22 = int_to_ptr.vmem [resolvable:$false] %s532_s22 }
  0x5f   : > { %v244_v6 = vsub.s32 6, %v204_v1  ;;  %v238_v10 = vsub.s32 2, %v204_v1  ;;  %v261_v15 = vsub.s32 7, %v204_v1  ;;  %v255_v24 = vsub.s32 3, %v204_v1  ;;  %p530_p6 = pnand %p529_p4, %p732_p10  ;;  %s534_s27 = scalar_lea.vmem %s533_s22, 256 }
  0x60   : > { %v206_v11 = vrot.slane %v198_v7, %v205_v2  ;;  %v212_v12 = vrot.slane %v198_v7, %v211_v3  ;;  %v222_v13 = vrot.slane %v198_v7, %v221_v4  ;;  %v228_v14 = vrot.slane %v198_v7, %v227_v5  ;;  %p535_p12 = scmp.lt.s32.totalorder %s802_s19, %s533_s22  ;;  %p536_p11 = scmp.lt.s32.totalorder %s534_s27, %s528_s24 }
  0x61   : > { %v245_v19 = vrot.slane %v198_v7, %v244_v6  ;;  %v239_v23 = vrot.slane %v198_v7, %v238_v10  ;;  %v262_v25 = vrot.slane %v198_v7, %v261_v15  ;;  %v256_v34 = vrot.slane %v198_v7, %v255_v24  ;;  %p531_p8 = pneg %p530_p6 }
  0x62   : > { %v207_v16 = vmul.f32 %v206_v11, %v199_v8  ;;  %v213_v17 = vmul.f32 %v212_v12, %v199_v8  ;;  %v229_v18 = vmul.f32 %v228_v14, %v200_v9  ;;  %v223_v22 = vmul.f32 %v222_v13, %v200_v9  ;;  %p537_p0 = por %p536_p11, %p535_p12 }
  0x63   : > { %v246_v29 = vmul.f32 %v245_v19, %v201_v20  ;;  %v240_v33 = vmul.f32 %v239_v23, %v201_v20  ;;  %v263_v38 = vmul.f32 %v262_v25, %v202_v30  ;;  %v257_v41 = vmul.f32 %v256_v34, %v202_v30 }
  0x64   : > { %v215_v21 = vrot.slane %v213_v17, 4  ;;  %v231_v28 = vrot.slane %v229_v18, 4  ;;  %p538_p5 = pnand %p537_p0, %p531_p8 }
  0x65   : > { %v248_v37 = vrot.slane %v246_v29, 4  ;;  %v265_v44 = vrot.slane %v263_v38, 4 }
  0x66   : > { %v217_v26 = vsub.f32 %v207_v16, %v215_v21  ;;  %v218_v27 = vadd.f32 %v215_v21, %v207_v16 }
  0x68   : > { %v224_v31 = vadd.f32 %v223_v22, %v217_v26  ;;  %v234_v32 = vadd.f32 %v223_v22, %v218_v27 }
  0x6a   : > { %v233_v35 = vsub.f32 %v224_v31, %v231_v28  ;;  %v235_v36 = vadd.f32 %v234_v32, %v231_v28 }
  0x6c   : > { %v241_v39 = vadd.f32 %v240_v33, %v233_v35  ;;  %v251_v40 = vadd.f32 %v240_v33, %v235_v36 }
  0x6e   : > { %v250_v42 = vsub.f32 %v241_v39, %v248_v37  ;;  %v252_v43 = vadd.f32 %v251_v40, %v248_v37 }
  0x70   : > { %v258_v45 = vadd.f32 %v257_v41, %v250_v42  ;;  %v268_v46 = vadd.f32 %v257_v41, %v252_v43 }
  0x72   : > { %v267_v47 = vsub.f32 %v258_v45, %v265_v44  ;;  %v269_v48 = vadd.f32 %v268_v46, %v265_v44 }
  0x74   : > { %v271_v49 = vsel %vm270_vm0, %v267_v47, %v269_v48 }
  0x75   : > { %272 = vst [vmem:[%s197_s17] sm:$0xff] %v271_v49 }
  0x76   : > { %541 = shalt.err (!%p538_p5)
}
  0x77   : > { %s542_s23 = scalar_lea.hbm %s807_s6, 128  ;;  %s546_s3 = scalar_lea.hbm %s856_s2, 256 }
  0x78   : > { %p543_p9 = scmp.ne.s32.totalorder %s807_s6, %s542_s23  ;;  %p547_p7 = scmp.lt.u32.totalorder %s807_s6, %s856_s2 }
  0x79   : > { %p548_p3 = scmp.lt.u32.totalorder %s546_s3, %s542_s23  ;;  %p550_p4 = scmp.lt.u32.totalorder %s542_s23, %s807_s6 }
  0x7a   : > { %p544_p1 = pnand %p543_p9, %p732_p10 }
  0x7b   : > { %p549_p13 = por %p548_p3, %p547_p7 }
  0x7c   : > { %p545_p2 = pneg %p544_p1 }
  0x7d   : > { %p551_p6 = por %p550_p4, %p549_p13 }
  0x7f   : > { %p552_p8 = pnand %p551_p6, %p545_p2 }
  0x81   : > { %555 = shalt.err (!%p552_p8)
}
  0x82   : > { %401 = dma.vmem_to_hbm [thread:$0]  (%p732_p10), %s802_s19, 128, %s807_s6, %s274_s7  }
  0x83 PF: > { %s300_s15 = sand.u32 1, %s594_s9   ;;  %p874_p12 = scmp.ne.s32.totalorder %s864_s20, 0 }
  0x84   : > { %p875_p11 = scmp.ge.s32.totalorder %s614_s14, 2  ;;  %s301_s16 = scalar_lea.sflag [#allocation4], %s300_s15 }
  0x86   : > { %p412_p0 = pnand %p875_p11, %p874_p12 }
  0x88   : > { %589 = dma.done.wait (!%p412_p0), %s301_s16, 128  }
  0x89   : > { %591 = vsyncadd (!%p412_p0), %s301_s16, 4294967168  ;;  %s19_s14 = sadd.s32 1, %s614_s14   ;;  %s876_s9 = smov %s598_s10 }
  0x8a   : > { %p16_p5 = scmp.ge.s32.totalorder %s19_s14, 4   ;;  %s877_s10 = smov %s602_s11 }
  0x8b   : > { %s878_s11 = smov %s741_s28  ;;  %s879_s12 = smov %s610_s13 }
  0x8c   : > { %s880_s13 = smov %s882_s25  ;;  %18 = sbr.rel (!%p16_p5) target bundleno = 7 (0x7), region = 78 }
  0x93   :  { %306 = vsyncpa [#allocation3], 1 }
  0x94   :  { %308 = vsyncpa [#allocation3 + $0x1], 1 }
  0x95   :  { %309 = vsyncpa [#allocation6], 1 }
  0x96   :  { %310 = vsyncpa [#allocation4], 1 }
  0x97   :  { %312 = vsyncpa [#allocation4 + $0x1], 1 }

</bundles_post_ra>
